<compile_context>
chip_gen: v7x
topology: tpu7x:2x2x1
jax: 0.10.0
libtpu: 0.0.40
codegen_flags: <defaults>
</compile_context>

<pallas_src>
import functools

import jax
import jax.numpy as jnp
from jax import lax
from jax.experimental import pallas as pl
from jax.experimental.pallas import tpu as pltpu


_EQ_NUMS = (0, 2, 3, 4, 5, 6, 7, 8, 9, 10, 11)


def _energy_evp_kernel(layout_ref, heat_ref, flow_ref,
                       heat_bc_ref, eq_mask_ref, mse_ref,
                       *, h, inv_h, inv_n):
    """Fused preprocessing + reflect stencil + masking + MSE reduction.

    layout_ref : (1, 2, H, W)  [geom, boundary]
    heat_ref   : (1, 1, H, W)
    flow_ref   : (1, 2, H, W)  [u, v]
    heat_bc_ref, eq_mask_ref : (H, W) VMEM outputs
    mse_ref    : (1, 1) SMEM scalar output
    """
    H, W = heat_bc_ref.shape

    row = lax.broadcasted_iota(jnp.int32, (H, W), 0)
    col = lax.broadcasted_iota(jnp.int32, (H, W), 1)

    g = layout_ref[0, 0].astype(jnp.float32)
    b = layout_ref[0, 1].astype(jnp.float32)
    t = heat_ref[0, 0].astype(jnp.float32)
    u = flow_ref[0, 0].astype(jnp.float32)
    v = flow_ref[0, 1].astype(jnp.float32)

    # ---- in-place edits from the reference forward (order matters) ----------
    g = jnp.where((row == 0) | (row == H - 1), 1.0, g)

    b = jnp.where((row == 1) & (col >= 1), 0.0, b)
    b = jnp.where((row == H - 2) & (col >= 1), 0.0, b)
    b = jnp.where(col == 1, 0.0, b)
    b = jnp.where(col == W - 1, 3.0, b)
    b = jnp.where(row == 0, 3.0, b)
    b = jnp.where(row == H - 1, 3.0, b)

    # ---- set_bc(bc_num=1, {'tmp': 0}):  heat_bc = heat * (b != 1) + 0 -------
    x = jnp.where(b == 1.0, 0.0, t)
    heat_bc_ref[...] = x

    # ---- f = cof * |geom - 1| * (300 * h) -----------------------------------
    f = jnp.abs(g - 1.0) * (300.0 * h)

    # ---- apply_Energy masks over eq_nums {0,2,...,11} -----------------------
    # Exact set-membership test (cheap in-VMEM VPU work); the collapsed form
    # (b != 1) would additionally assume boundary codes are integers in [0,11].
    emask = jnp.zeros_like(b)
    for e in (0.0, 2.0, 3.0, 4.0, 5.0, 6.0, 7.0, 8.0, 9.0, 10.0, 11.0):
        emask = emask + (b == e).astype(jnp.float32)
    eq_mask_ref[...] = b * emask          # == sum_e e * (b == e)  (disjoint)

    # ---- 5-point reflect-padded stencil via XLU rolls + edge fix-ups --------
    # roll(x, +1) brings the previous element; a shift of W-1 / H-1 == -1.
    xl_w = pltpu.roll(x, 1, axis=1)       # x[i, j-1]  (wrapped)
    xr_w = pltpu.roll(x, W - 1, axis=1)   # x[i, j+1]  (wrapped)
    xu_w = pltpu.roll(x, 1, axis=0)       # x[i-1, j]  (wrapped)
    xd_w = pltpu.roll(x, H - 1, axis=0)   # x[i+1, j]  (wrapped)
    # Reflect padding (edge excluded): neighbour of col 0 is col 1, etc.
    xl = jnp.where(col == 0, xr_w, xl_w)
    xr = jnp.where(col == W - 1, xl_w, xr_w)
    xu = jnp.where(row == 0, xd_w, xu_w)
    xd = jnp.where(row == H - 1, xu_w, xd_w)

    dx = 0.5 * (xr - xl)                  # Dx conv (valid)
    dy = 0.5 * (xd - xu)                  # Dy conv (valid)
    lap = xl + xr + xu + xd - 4.0 * x     # laplace conv (valid)

    # advection_diffusion with heat_new == 0 and diff_coeff == 1:
    #   (0 - x)*h + (u*Dx + v*Dy - laplace/h)
    adv = u * dx + v * dy - lap * inv_h - h * x
    diff = emask * adv - f
    mse_ref[0, 0] = jnp.sum(diff * diff) * inv_n


def _energy_evp_pallas(layout, heat, flow, h):
    _, _, H, W = heat.shape
    kernel = functools.partial(
        _energy_evp_kernel, h=float(h), inv_h=1.0 / float(h),
        inv_n=1.0 / float(H * W))

    call_kwargs = {}
    # Generous bound: 5 input planes + 2 output planes + temporaries.
    vmem_bytes = 24 * H * W * 4 + (2 << 20)
    if vmem_bytes > (32 << 20):
        # Only needed for very large planes (beyond the v6e scoped default).
        # TODO(synk): on v7x (64 MiB VMEM, 2 TCs) switch to a row-tiled grid
        # with a 1-row halo and per-tile partial sums instead of one big block.
        call_kwargs["compiler_params"] = pltpu.CompilerParams(
            vmem_limit_bytes=min(vmem_bytes, 100 << 20))

    heat_bc, eq_mask, mse = pl.pallas_call(
        kernel,
        out_shape=(jax.ShapeDtypeStruct((H, W), jnp.float32),   # heat_bc
                   jax.ShapeDtypeStruct((H, W), jnp.float32),   # eq_mask
                   jax.ShapeDtypeStruct((1, 1), jnp.float32)),  # mse
        in_specs=[pl.BlockSpec(memory_space=pltpu.MemorySpace.VMEM)] * 3,
        out_specs=(pl.BlockSpec(memory_space=pltpu.MemorySpace.VMEM),
                   pl.BlockSpec(memory_space=pltpu.MemorySpace.VMEM),
                   pl.BlockSpec(memory_space=pltpu.MemorySpace.SMEM)),
        **call_kwargs,
    )(layout, heat, flow)
    return mse[0, 0], heat_bc, eq_mask


def _energy_evp_reference(layout, heat, flow, h):
    """Pure-JAX transcription of the original module (used for tiny fields
    and for correctness checking)."""
    u = flow[0, 0].astype(jnp.float32)
    v = flow[0, 1].astype(jnp.float32)
    geom = layout[0, 0].astype(jnp.float32)
    bnd = layout[0, 1].astype(jnp.float32)
    t = heat[0, 0].astype(jnp.float32)

    geom = geom.at[0, :].set(1.0).at[-1, :].set(1.0)
    bnd = bnd.at[1, 1:].set(0.0)
    bnd = bnd.at[-2, 1:].set(0.0)
    bnd = bnd.at[:, 1].set(0.0)
    bnd = bnd.at[:, -1].set(3.0)
    bnd = bnd.at[0, :].set(3.0)
    bnd = bnd.at[-1, :].set(3.0)

    heat_bc = t * jnp.where(bnd == 1.0, 0.0, 1.0)
    f = jnp.abs(geom - 1.0) * (300.0 * h)

    emask = jnp.zeros_like(bnd)
    eq_mask = jnp.zeros_like(bnd)
    for e in _EQ_NUMS:
        sel = bnd == float(e)
        emask = emask + sel.astype(jnp.float32)
        eq_mask = jnp.where(sel, float(e), eq_mask)

    xp = jnp.pad(heat_bc, 1, mode="reflect")
    c = xp[1:-1, 1:-1]
    xl = xp[1:-1, :-2]
    xr = xp[1:-1, 2:]
    xu = xp[:-2, 1:-1]
    xd = xp[2:, 1:-1]
    dx = 0.5 * (xr - xl)
    dy = 0.5 * (xd - xu)
    lap = xl + xr + xu + xd - 4.0 * c
    adv = (0.0 - c) * h + (u * dx + v * dy - lap / h)
    d = emask * adv - f
    return jnp.mean(d * d), heat_bc, eq_mask


def energy_evp_forward(layout, heat_ini, wc, heat, flow,
                       nx=16, length_x=6.0, use_pallas=None):
    """JAX port of Energy_Evp_layer.forward (batch == 1).

    Returns (mse_energy, heat_bc, heat_new, eq_mask) exactly like the
    PyTorch module.
    """
    del heat_ini, wc   # only feed code that is dead w.r.t. returned outputs
    assert layout.shape[0] == 1, "reference module semantics require batch=1"
    h = length_x / nx
    _, _, H, W = heat.shape
    if use_pallas is None:
        # Below ~2 vregs per plane the fixed pallas_call cost dominates; a
        # single XLA fusion is faster there.
        use_pallas = (H * W) >= 2048

    if use_pallas:
        mse, heat_bc2d, eq_mask = _energy_evp_pallas(layout, heat, flow, h)
    else:
        mse, heat_bc2d, eq_mask = _energy_evp_reference(layout, heat, flow, h)

    heat_bc = heat_bc2d[None, None]        # back to [1, 1, H, W] (free reshape)
    heat_new = jnp.zeros_like(heat_bc)
    # TODO(synk): apply_evp / wc_evp loop is dead w.r.t. every returned value
    # (mse_wc == 0); port it only if its m_dot / cp_a side-products are needed.
    return mse, heat_bc, heat_new, eq_mask


if __name__ == "__main__":
    # Small but lane-aligned shapes (module default width ny=128).
    B, H, W = 1, 32, 128
    key = jax.random.PRNGKey(0)
    k1, k2, k3, k4, k5, k6 = jax.random.split(key, 6)

    geom_ch = jax.random.uniform(k1, (B, 1, H, W), dtype=jnp.float32)
    boundary_ch = jax.random.randint(k2, (B, 1, H, W), 0, 12).astype(jnp.float32)
    layout = jnp.concatenate([geom_ch, boundary_ch], axis=1)     # [1, 2, H, W]
    heat_ini = jax.random.normal(k3, (B, 1, H, W), dtype=jnp.float32)
    wc = jax.random.uniform(k4, (B, 1, H, W), dtype=jnp.float32)
    heat = jax.random.normal(k5, (B, 1, H, W), dtype=jnp.float32)
    flow = jax.random.normal(k6, (B, 2, H, W), dtype=jnp.float32)

    fwd = jax.jit(functools.partial(energy_evp_forward,
                                    nx=16, length_x=6.0, use_pallas=True))
    mse, heat_bc, heat_new, eq_mask = fwd(layout, heat_ini, wc, heat, flow)
    jax.block_until_ready((mse, heat_bc, heat_new, eq_mask))

    # Validate the fused Pallas path against a pure-JAX transcription of the
    # original module (independent padding / mask-loop implementation).
    ref_fwd = jax.jit(functools.partial(energy_evp_forward,
                                        nx=16, length_x=6.0, use_pallas=False))
    mse_ref, heat_bc_ref, _, eq_mask_ref = ref_fwd(layout, heat_ini, wc, heat, flow)
    assert jnp.allclose(mse, mse_ref, rtol=1e-4, atol=1e-4), (mse, mse_ref)
    assert jnp.allclose(heat_bc, heat_bc_ref)
    assert jnp.allclose(eq_mask, eq_mask_ref)

    print("KERNEL_OK")
</pallas_src>

<mosaic_0001>
module attributes {stable_mosaic.version = 11 : i64} {
  func.func @_energy_evp_kernel(%arg0: memref<1x2x32x128xf32, #tpu.memory_space<vmem>>, %arg1: memref<1x1x32x128xf32, #tpu.memory_space<vmem>>, %arg2: memref<1x2x32x128xf32, #tpu.memory_space<vmem>>, %arg3: memref<32x128xf32, #tpu.memory_space<vmem>>, %arg4: memref<32x128xf32, #tpu.memory_space<vmem>>, %arg5: memref<1x1xf32, #tpu.memory_space<smem>>) attributes {dimension_semantics = [], scalar_prefetch = 0 : i64, scratch_operands = 0 : i64, tpu.core_type = #tpu.core_type<tc>} {
    %0 = tpu.iota {dimensions = array<i32: 0>} : vector<32x128xi32>
    %1 = tpu.iota {dimensions = array<i32: 1>} : vector<32x128xi32>
    %c0 = arith.constant 0 : index
    %c0_0 = arith.constant 0 : index
    %c0_1 = arith.constant 0 : index
    %c0_2 = arith.constant 0 : index
    %2 = vector.load %arg0[%c0, %c0_0, %c0_1, %c0_2] : memref<1x2x32x128xf32, #tpu.memory_space<vmem>>, vector<1x1x32x128xf32>
    %3 = vector.shape_cast %2 : vector<1x1x32x128xf32> to vector<32x128xf32>
    %c0_3 = arith.constant 0 : index
    %c1 = arith.constant 1 : index
    %c0_4 = arith.constant 0 : index
    %c0_5 = arith.constant 0 : index
    %4 = vector.load %arg0[%c0_3, %c1, %c0_4, %c0_5] : memref<1x2x32x128xf32, #tpu.memory_space<vmem>>, vector<1x1x32x128xf32>
    %5 = vector.shape_cast %4 : vector<1x1x32x128xf32> to vector<32x128xf32>
    %c0_6 = arith.constant 0 : index
    %c0_7 = arith.constant 0 : index
    %c0_8 = arith.constant 0 : index
    %c0_9 = arith.constant 0 : index
    %6 = vector.load %arg1[%c0_6, %c0_7, %c0_8, %c0_9] : memref<1x1x32x128xf32, #tpu.memory_space<vmem>>, vector<1x1x32x128xf32>
    %7 = vector.shape_cast %6 : vector<1x1x32x128xf32> to vector<32x128xf32>
    %c0_10 = arith.constant 0 : index
    %c0_11 = arith.constant 0 : index
    %c0_12 = arith.constant 0 : index
    %c0_13 = arith.constant 0 : index
    %8 = vector.load %arg2[%c0_10, %c0_11, %c0_12, %c0_13] : memref<1x2x32x128xf32, #tpu.memory_space<vmem>>, vector<1x1x32x128xf32>
    %9 = vector.shape_cast %8 : vector<1x1x32x128xf32> to vector<32x128xf32>
    %c0_14 = arith.constant 0 : index
    %c1_15 = arith.constant 1 : index
    %c0_16 = arith.constant 0 : index
    %c0_17 = arith.constant 0 : index
    %10 = vector.load %arg2[%c0_14, %c1_15, %c0_16, %c0_17] : memref<1x2x32x128xf32, #tpu.memory_space<vmem>>, vector<1x1x32x128xf32>
    %11 = vector.shape_cast %10 : vector<1x1x32x128xf32> to vector<32x128xf32>
    %c0_i32 = arith.constant 0 : i32
    %12 = vector.broadcast %c0_i32 : i32 to vector<32x128xi32>
    %13 = arith.cmpi eq, %0, %12 : vector<32x128xi32>
    %c31_i32 = arith.constant 31 : i32
    %14 = vector.broadcast %c31_i32 : i32 to vector<32x128xi32>
    %15 = arith.cmpi eq, %0, %14 : vector<32x128xi32>
    %16 = arith.ori %13, %15 : vector<32x128xi1>
    %cst = arith.constant 1.000000e+00 : f32
    %17 = vector.broadcast %cst : f32 to vector<32x128xf32>
    %18 = arith.select %16, %17, %3 : vector<32x128xi1>, vector<32x128xf32>
    %c1_i32 = arith.constant 1 : i32
    %19 = vector.broadcast %c1_i32 : i32 to vector<32x128xi32>
    %20 = arith.cmpi eq, %0, %19 : vector<32x128xi32>
    %c1_i32_18 = arith.constant 1 : i32
    %21 = vector.broadcast %c1_i32_18 : i32 to vector<32x128xi32>
    %22 = arith.cmpi sge, %1, %21 : vector<32x128xi32>
    %23 = arith.andi %20, %22 : vector<32x128xi1>
    %cst_19 = arith.constant 0.000000e+00 : f32
    %24 = vector.broadcast %cst_19 : f32 to vector<32x128xf32>
    %25 = arith.select %23, %24, %5 : vector<32x128xi1>, vector<32x128xf32>
    %c30_i32 = arith.constant 30 : i32
    %26 = vector.broadcast %c30_i32 : i32 to vector<32x128xi32>
    %27 = arith.cmpi eq, %0, %26 : vector<32x128xi32>
    %c1_i32_20 = arith.constant 1 : i32
    %28 = vector.broadcast %c1_i32_20 : i32 to vector<32x128xi32>
    %29 = arith.cmpi sge, %1, %28 : vector<32x128xi32>
    %30 = arith.andi %27, %29 : vector<32x128xi1>
    %cst_21 = arith.constant 0.000000e+00 : f32
    %31 = vector.broadcast %cst_21 : f32 to vector<32x128xf32>
    %32 = arith.select %30, %31, %25 : vector<32x128xi1>, vector<32x128xf32>
    %c1_i32_22 = arith.constant 1 : i32
    %33 = vector.broadcast %c1_i32_22 : i32 to vector<32x128xi32>
    %34 = arith.cmpi eq, %1, %33 : vector<32x128xi32>
    %cst_23 = arith.constant 0.000000e+00 : f32
    %35 = vector.broadcast %cst_23 : f32 to vector<32x128xf32>
    %36 = arith.select %34, %35, %32 : vector<32x128xi1>, vector<32x128xf32>
    %c127_i32 = arith.constant 127 : i32
    %37 = vector.broadcast %c127_i32 : i32 to vector<32x128xi32>
    %38 = arith.cmpi eq, %1, %37 : vector<32x128xi32>
    %cst_24 = arith.constant 3.000000e+00 : f32
    %39 = vector.broadcast %cst_24 : f32 to vector<32x128xf32>
    %40 = arith.select %38, %39, %36 : vector<32x128xi1>, vector<32x128xf32>
    %c0_i32_25 = arith.constant 0 : i32
    %41 = vector.broadcast %c0_i32_25 : i32 to vector<32x128xi32>
    %42 = arith.cmpi eq, %0, %41 : vector<32x128xi32>
    %cst_26 = arith.constant 3.000000e+00 : f32
    %43 = vector.broadcast %cst_26 : f32 to vector<32x128xf32>
    %44 = arith.select %42, %43, %40 : vector<32x128xi1>, vector<32x128xf32>
    %c31_i32_27 = arith.constant 31 : i32
    %45 = vector.broadcast %c31_i32_27 : i32 to vector<32x128xi32>
    %46 = arith.cmpi eq, %0, %45 : vector<32x128xi32>
    %cst_28 = arith.constant 3.000000e+00 : f32
    %47 = vector.broadcast %cst_28 : f32 to vector<32x128xf32>
    %48 = arith.select %46, %47, %44 : vector<32x128xi1>, vector<32x128xf32>
    %cst_29 = arith.constant 1.000000e+00 : f32
    %49 = vector.broadcast %cst_29 : f32 to vector<32x128xf32>
    %50 = arith.cmpf oeq, %48, %49 : vector<32x128xf32>
    %cst_30 = arith.constant 0.000000e+00 : f32
    %51 = vector.broadcast %cst_30 : f32 to vector<32x128xf32>
    %52 = arith.select %50, %51, %7 : vector<32x128xi1>, vector<32x128xf32>
    %c0_31 = arith.constant 0 : index
    %c0_32 = arith.constant 0 : index
    %53 = vector.load %arg3[%c0_31, %c0_32] : memref<32x128xf32, #tpu.memory_space<vmem>>, vector<32x128xf32>
    tpu.vector_store %arg3[%c0_31, %c0_32], %52 {strides = array<i32>} : memref<32x128xf32, #tpu.memory_space<vmem>>, vector<32x128xf32>,
    %cst_33 = arith.constant 1.000000e+00 : f32
    %54 = vector.broadcast %cst_33 : f32 to vector<32x128xf32>
    %55 = arith.subf %18, %54 : vector<32x128xf32>
    %56 = math.absf %55 : vector<32x128xf32>
    %cst_34 = arith.constant 1.125000e+02 : f32
    %57 = vector.broadcast %cst_34 : f32 to vector<32x128xf32>
    %58 = arith.mulf %56, %57 : vector<32x128xf32>
    %cst_35 = arith.constant 0.000000e+00 : f32
    %59 = vector.broadcast %cst_35 : f32 to vector<32x128xf32>
    %cst_36 = arith.constant 0.000000e+00 : f32
    %60 = vector.broadcast %cst_36 : f32 to vector<32x128xf32>
    %61 = arith.cmpf oeq, %48, %60 : vector<32x128xf32>
    %62 = arith.extui %61 : vector<32x128xi1> to vector<32x128xi32>
    %63 = arith.sitofp %62 : vector<32x128xi32> to vector<32x128xf32>
    %64 = arith.addf %59, %63 : vector<32x128xf32>
    %cst_37 = arith.constant 2.000000e+00 : f32
    %65 = vector.broadcast %cst_37 : f32 to vector<32x128xf32>
    %66 = arith.cmpf oeq, %48, %65 : vector<32x128xf32>
    %67 = arith.extui %66 : vector<32x128xi1> to vector<32x128xi32>
    %68 = arith.sitofp %67 : vector<32x128xi32> to vector<32x128xf32>
    %69 = arith.addf %64, %68 : vector<32x128xf32>
    %cst_38 = arith.constant 3.000000e+00 : f32
    %70 = vector.broadcast %cst_38 : f32 to vector<32x128xf32>
    %71 = arith.cmpf oeq, %48, %70 : vector<32x128xf32>
    %72 = arith.extui %71 : vector<32x128xi1> to vector<32x128xi32>
    %73 = arith.sitofp %72 : vector<32x128xi32> to vector<32x128xf32>
    %74 = arith.addf %69, %73 : vector<32x128xf32>
    %cst_39 = arith.constant 4.000000e+00 : f32
    %75 = vector.broadcast %cst_39 : f32 to vector<32x128xf32>
    %76 = arith.cmpf oeq, %48, %75 : vector<32x128xf32>
    %77 = arith.extui %76 : vector<32x128xi1> to vector<32x128xi32>
    %78 = arith.sitofp %77 : vector<32x128xi32> to vector<32x128xf32>
    %79 = arith.addf %74, %78 : vector<32x128xf32>
    %cst_40 = arith.constant 5.000000e+00 : f32
    %80 = vector.broadcast %cst_40 : f32 to vector<32x128xf32>
    %81 = arith.cmpf oeq, %48, %80 : vector<32x128xf32>
    %82 = arith.extui %81 : vector<32x128xi1> to vector<32x128xi32>
    %83 = arith.sitofp %82 : vector<32x128xi32> to vector<32x128xf32>
    %84 = arith.addf %79, %83 : vector<32x128xf32>
    %cst_41 = arith.constant 6.000000e+00 : f32
    %85 = vector.broadcast %cst_41 : f32 to vector<32x128xf32>
    %86 = arith.cmpf oeq, %48, %85 : vector<32x128xf32>
    %87 = arith.extui %86 : vector<32x128xi1> to vector<32x128xi32>
    %88 = arith.sitofp %87 : vector<32x128xi32> to vector<32x128xf32>
    %89 = arith.addf %84, %88 : vector<32x128xf32>
    %cst_42 = arith.constant 7.000000e+00 : f32
    %90 = vector.broadcast %cst_42 : f32 to vector<32x128xf32>
    %91 = arith.cmpf oeq, %48, %90 : vector<32x128xf32>
    %92 = arith.extui %91 : vector<32x128xi1> to vector<32x128xi32>
    %93 = arith.sitofp %92 : vector<32x128xi32> to vector<32x128xf32>
    %94 = arith.addf %89, %93 : vector<32x128xf32>
    %cst_43 = arith.constant 8.000000e+00 : f32
    %95 = vector.broadcast %cst_43 : f32 to vector<32x128xf32>
    %96 = arith.cmpf oeq, %48, %95 : vector<32x128xf32>
    %97 = arith.extui %96 : vector<32x128xi1> to vector<32x128xi32>
    %98 = arith.sitofp %97 : vector<32x128xi32> to vector<32x128xf32>
    %99 = arith.addf %94, %98 : vector<32x128xf32>
    %cst_44 = arith.constant 9.000000e+00 : f32
    %100 = vector.broadcast %cst_44 : f32 to vector<32x128xf32>
    %101 = arith.cmpf oeq, %48, %100 : vector<32x128xf32>
    %102 = arith.extui %101 : vector<32x128xi1> to vector<32x128xi32>
    %103 = arith.sitofp %102 : vector<32x128xi32> to vector<32x128xf32>
    %104 = arith.addf %99, %103 : vector<32x128xf32>
    %cst_45 = arith.constant 1.000000e+01 : f32
    %105 = vector.broadcast %cst_45 : f32 to vector<32x128xf32>
    %106 = arith.cmpf oeq, %48, %105 : vector<32x128xf32>
    %107 = arith.extui %106 : vector<32x128xi1> to vector<32x128xi32>
    %108 = arith.sitofp %107 : vector<32x128xi32> to vector<32x128xf32>
    %109 = arith.addf %104, %108 : vector<32x128xf32>
    %cst_46 = arith.constant 1.100000e+01 : f32
    %110 = vector.broadcast %cst_46 : f32 to vector<32x128xf32>
    %111 = arith.cmpf oeq, %48, %110 : vector<32x128xf32>
    %112 = arith.extui %111 : vector<32x128xi1> to vector<32x128xi32>
    %113 = arith.sitofp %112 : vector<32x128xi32> to vector<32x128xf32>
    %114 = arith.addf %109, %113 : vector<32x128xf32>
    %115 = arith.mulf %48, %114 : vector<32x128xf32>
    %c0_47 = arith.constant 0 : index
    %c0_48 = arith.constant 0 : index
    %116 = vector.load %arg4[%c0_47, %c0_48] : memref<32x128xf32, #tpu.memory_space<vmem>>, vector<32x128xf32>
    tpu.vector_store %arg4[%c0_47, %c0_48], %115 {strides = array<i32>} : memref<32x128xf32, #tpu.memory_space<vmem>>, vector<32x128xf32>,
    %c1_i32_49 = arith.constant 1 : i32
    %117 = tpu.dynamic_rotate %52 by %c1_i32_49 dim 1 : vector<32x128xf32>, i32 -> vector<32x128xf32>
    %c127_i32_50 = arith.constant 127 : i32
    %118 = tpu.dynamic_rotate %52 by %c127_i32_50 dim 1 : vector<32x128xf32>, i32 -> vector<32x128xf32>
    %c1_i32_51 = arith.constant 1 : i32
    %119 = tpu.dynamic_rotate %52 by %c1_i32_51 dim 0 : vector<32x128xf32>, i32 -> vector<32x128xf32>
    %c31_i32_52 = arith.constant 31 : i32
    %120 = tpu.dynamic_rotate %52 by %c31_i32_52 dim 0 : vector<32x128xf32>, i32 -> vector<32x128xf32>
    %c0_i32_53 = arith.constant 0 : i32
    %121 = vector.broadcast %c0_i32_53 : i32 to vector<32x128xi32>
    %122 = arith.cmpi eq, %1, %121 : vector<32x128xi32>
    %123 = arith.select %122, %118, %117 : vector<32x128xi1>, vector<32x128xf32>
    %c127_i32_54 = arith.constant 127 : i32
    %124 = vector.broadcast %c127_i32_54 : i32 to vector<32x128xi32>
    %125 = arith.cmpi eq, %1, %124 : vector<32x128xi32>
    %126 = arith.select %125, %117, %118 : vector<32x128xi1>, vector<32x128xf32>
    %c0_i32_55 = arith.constant 0 : i32
    %127 = vector.broadcast %c0_i32_55 : i32 to vector<32x128xi32>
    %128 = arith.cmpi eq, %0, %127 : vector<32x128xi32>
    %129 = arith.select %128, %120, %119 : vector<32x128xi1>, vector<32x128xf32>
    %c31_i32_56 = arith.constant 31 : i32
    %130 = vector.broadcast %c31_i32_56 : i32 to vector<32x128xi32>
    %131 = arith.cmpi eq, %0, %130 : vector<32x128xi32>
    %132 = arith.select %131, %119, %120 : vector<32x128xi1>, vector<32x128xf32>
    %133 = arith.subf %126, %123 : vector<32x128xf32>
    %cst_57 = arith.constant 5.000000e-01 : f32
    %134 = vector.broadcast %cst_57 : f32 to vector<32x128xf32>
    %135 = arith.mulf %134, %133 : vector<32x128xf32>
    %136 = arith.subf %132, %129 : vector<32x128xf32>
    %cst_58 = arith.constant 5.000000e-01 : f32
    %137 = vector.broadcast %cst_58 : f32 to vector<32x128xf32>
    %138 = arith.mulf %137, %136 : vector<32x128xf32>
    %139 = arith.addf %123, %126 : vector<32x128xf32>
    %140 = arith.addf %139, %129 : vector<32x128xf32>
    %141 = arith.addf %140, %132 : vector<32x128xf32>
    %cst_59 = arith.constant 4.000000e+00 : f32
    %142 = vector.broadcast %cst_59 : f32 to vector<32x128xf32>
    %143 = arith.mulf %142, %52 : vector<32x128xf32>
    %144 = arith.subf %141, %143 : vector<32x128xf32>
    %145 = arith.mulf %9, %135 : vector<32x128xf32>
    %146 = arith.mulf %11, %138 : vector<32x128xf32>
    %147 = arith.addf %145, %146 : vector<32x128xf32>
    %cst_60 = arith.constant 2.66666675 : f32
    %148 = vector.broadcast %cst_60 : f32 to vector<32x128xf32>
    %149 = arith.mulf %144, %148 : vector<32x128xf32>
    %150 = arith.subf %147, %149 : vector<32x128xf32>
    %cst_61 = arith.constant 3.750000e-01 : f32
    %151 = vector.broadcast %cst_61 : f32 to vector<32x128xf32>
    %152 = arith.mulf %151, %52 : vector<32x128xf32>
    %153 = arith.subf %150, %152 : vector<32x128xf32>
    %154 = arith.mulf %114, %153 : vector<32x128xf32>
    %155 = arith.subf %154, %58 : vector<32x128xf32>
    %156 = arith.mulf %155, %155 : vector<32x128xf32>
    %157 = vector.shape_cast %156 : vector<32x128xf32> to vector<1x32x128xf32>
    %cst_62 = arith.constant dense<0.000000e+00> : vector<1xf32>
    %158 = vector.multi_reduction <add>, %157, %cst_62 [1, 2] : vector<1x32x128xf32> to vector<1xf32>
    %159 = vector.shape_cast %158 : vector<1xf32> to vector<1x1x1xf32>
    %160 = vector.extract %159[0, 0, 0] : f32 from vector<1x1x1xf32>
    %cst_63 = arith.constant 2.44140625E-4 : f32
    %161 = arith.mulf %160, %cst_63 : f32
    %c0_64 = arith.constant 0 : index
    %c0_65 = arith.constant 0 : index
    %162 = memref.load %arg5[%c0_64, %c0_65] : memref<1x1xf32, #tpu.memory_space<smem>>
    memref.store %161, %arg5[%c0_64, %c0_65] : memref<1x1xf32, #tpu.memory_space<smem>>
    return
  }
}

</mosaic_0001>

<bundles_post_ra>
// kernel: energy_evp_forward.1
= control target key start
LH: loop header
LB: loop body
LE: loop exit
PB: predicated region body
PF: predicated region fallthrough
CT: control target
= control target key end

     0   :  { %11 = vsyncpa [#allocation3], 0  ;;  %s1218_s0 = inlined_call_operand.hbm [shape: f32[1,2,32,128], index: 0, kind: input, shape index: {}]   ;;  %s1219_s1 = inlined_call_operand.hbm [shape: f32[1,1,32,128], index: 1, kind: input, shape index: {}]   ;;  %s1220_s2 = inlined_call_operand.hbm [shape: f32[1,2,32,128], index: 2, kind: input, shape index: {}]   ;;  %s1221_s3 = inlined_call_operand.hbm [shape: f32[32,128], index: 3, kind: output, shape index: {0}]   ;;  %s1222_s4 = inlined_call_operand.hbm [shape: f32[32,128], index: 4, kind: output, shape index: {1}]   ;;  %s1223_s5 = inlined_call_operand.hbm [shape: f32[1,1], index: 5, kind: output, shape index: {2}]  }
   0x1   :  { %12 = vsyncpa [#allocation7], 0 }
   0x2   :  { %13 = vsyncpa [#allocation4], 0 }
   0x3   :  { %14 = vsyncpa [#allocation11], 0 }
   0x4   :  { %15 = vsyncpa [#allocation5], 0  ;;  %s737_s18 = smov [#allocation6]   ;;  %s738_s20 = smov [#allocation2]  }
   0x5   :  { %s33_s19 = sshll.u32 %s737_s18, 4  ;;  %s21_s21 = sshll.u32 %s738_s20, 4  ;;  %s34_s19 = int_to_ptr.vmem [resolvable:$true] %s33_s19  ;;  %s778_s21 = int_to_ptr.vmem [resolvable:$true] %s21_s21 }
   0x6   :  { %s607_s24 = scalar_lea.hbm %s1219_s1, 512 }
   0x7   :  { %p608_p0 = scmp.ne.s32.totalorder %s1219_s1, %s607_s24  ;;  %p611_p1 = scmp.lt.u32.totalorder %s607_s24, %s1219_s1 }
   0x9   :  { %p613_p2 = pnand %p611_p1, %p608_p0 }
   0xb   :  { %616 = shalt.err (!%p613_p2)
}
   0xc   :  { %s617_s29 = scalar_lea.vmem %s34_s19, 512  ;;  %p622_p4 = scmp.lt.s32.totalorder %s34_s19, %s34_s19 }
   0xd   :  { %p618_p3 = scmp.ne.s32.totalorder %s34_s19, %s617_s29  ;;  %p623_p5 = scmp.lt.s32.totalorder %s617_s29, %s617_s29 }
   0xf   :  { %p624_p6 = por %p623_p5, %p622_p4 }
  0x11   :  { %p625_p7 = pnand %p624_p6, %p618_p3 }
  0x13   :  { %628 = shalt.err (!%p625_p7)
}
  0x14   :  { %s739_s30 = smov 128   ;;  %s740_s6 = smov 8  }
  0x15   :  { %39 = dma.hbm_to_vmem [thread:$0]  %s1219_s1, 512, %s34_s19, [#allocation7], %s739_s30, %s739_s30, %s740_s6  }
  0x16   :  { %s629_s11 = scalar_lea.hbm %s1218_s0, 1024 }
  0x17   :  { %p630_p8 = scmp.ne.s32.totalorder %s1218_s0, %s629_s11  ;;  %p633_p9 = scmp.lt.u32.totalorder %s629_s11, %s1218_s0 }
  0x19   :  { %p635_p10 = pnand %p633_p9, %p630_p8 }
  0x1b   :  { %638 = shalt.err (!%p635_p10)
}
  0x1c   :  { %s639_s16 = scalar_lea.vmem %s778_s21, 1024  ;;  %p644_p12 = scmp.lt.s32.totalorder %s778_s21, %s778_s21 }
  0x1d   :  { %p640_p11 = scmp.ne.s32.totalorder %s778_s21, %s639_s16  ;;  %p645_p13 = scmp.lt.s32.totalorder %s639_s16, %s639_s16 }
  0x1f   :  { %p646_p0 = por %p645_p13, %p644_p12 }
  0x21   :  { %p647_p1 = pnand %p646_p0, %p640_p11 }
  0x23   :  { %650 = shalt.err (!%p647_p1)
}
  0x24   :  { %27 = dma.hbm_to_vmem [thread:$0]  %s1218_s0, 1024, %s778_s21, [#allocation3], %s739_s30, %s739_s30, %s740_s6  }
  0x25   :  { %s741_s18 = smov [#allocation8]   ;;  %s651_s23 = scalar_lea.hbm %s1220_s2, 1024 }
  0x26   :  { %s45_s19 = sshll.u32 %s741_s18, 4  ;;  %p652_p2 = scmp.ne.s32.totalorder %s1220_s2, %s651_s23  ;;  %s46_s19 = int_to_ptr.vmem [resolvable:$true] %s45_s19 }
  0x27   :  { %p655_p3 = scmp.lt.u32.totalorder %s651_s23, %s1220_s2 }
  0x29   :  { %p657_p4 = pnand %p655_p3, %p652_p2 }
  0x2b   :  { %660 = shalt.err (!%p657_p4)
}
  0x2c   :  { %s661_s28 = scalar_lea.vmem %s46_s19, 1024  ;;  %p666_p6 = scmp.lt.s32.totalorder %s46_s19, %s46_s19 }
  0x2d   :  { %p662_p5 = scmp.ne.s32.totalorder %s46_s19, %s661_s28  ;;  %p667_p7 = scmp.lt.s32.totalorder %s661_s28, %s661_s28 }
  0x2f   :  { %p668_p8 = por %p667_p7, %p666_p6 }
  0x31   :  { %p669_p9 = pnand %p668_p8, %p662_p5 }
  0x33   :  { %672 = shalt.err (!%p669_p9)
}
  0x34   :  { %51 = dma.hbm_to_vmem [thread:$0]  %s1220_s2, 1024, %s46_s19, [#allocation7], %s739_s30, %s739_s30, %s740_s6  }
  0x35   :  { %727 = dma.done.wait [#allocation3], 1024  }
  0x36   :  { %728 = vsyncadd [#allocation3], 4294966272 }
  0x37   :  { %729 = dma.done.wait [#allocation7], 1536  }
  0x38   :  { %730 = vsyncadd [#allocation7], 4294965760  ;;  %v61_v0 = vlaneseq  ;;  %v74_v5 = vld [vmem:[#allocation2 + $0x28] sm:$0xff]  ;;  %v75_v6 = vld [vmem:[#allocation2 + $0x30] sm:$0xff]  ;;  %s742_s2 = smov 127   ;;  %s743_s29 = smov 1  }
  0x39   :  { %v78_v7 = vld [vmem:[#allocation6 + $0x8] sm:$0xff]  ;;  %v79_v9 = vld [vmem:[#allocation6 + $0x10] sm:$0xff]  ;;  %v73_v11 = vld [vmem:[#allocation2 + $0x20] sm:$0xff]  ;;  %v744_v51 = vmov 0.0   ;;  %s745_s7 = smov [#allocation9]   ;;  %s746_s9 = smov [#allocation10]  }
  0x3a   :  { %v830_v1 = vand.u32 127, %v61_v0  ;;  %v832_v2 = vshrl.u32 %v61_v0, 7  ;;  %v76_v15 = vld [vmem:[#allocation2 + $0x38] sm:$0xff]  ;;  %v77_v20 = vld [vmem:[#allocation6] sm:$0xff]  ;;  %s504_s8 = sshll.u32 %s745_s7, 4  ;;  %s516_s10 = sshll.u32 %s746_s9, 4  ;;  %s505_s8 = int_to_ptr.vmem [resolvable:$true] %s504_s8  ;;  %s1169_s10 = int_to_ptr.vmem [resolvable:$true] %s516_s10 }
  0x3b   :  { %v80_v24 = vld [vmem:[#allocation6 + $0x18] sm:$0xff]  ;;  %s673_s11 = scalar_lea.vmem %s505_s8, 512  ;;  %p678_p11 = scmp.lt.s32.totalorder %s505_s8, %s505_s8 }
  0x3c   :  { %vm106_vm0 = vcmp.eq.s32.totalorder %v832_v2, 1  ;;  %vm131_vm1 = vcmp.eq.s32.totalorder %v830_v1, 1  ;;  %vm110_vm2 = vcmp.ge.s32.totalorder %v830_v1, 1  ;;  %v838_v3 = vadd.s32 24, %v832_v2  ;;  %p674_p10 = scmp.ne.s32.totalorder %s505_s8, %s673_s11  ;;  %p679_p12 = scmp.lt.s32.totalorder %s673_s11, %s673_s11 }
  0x3d   :  { %vm136_vm3 = vcmp.eq.s32.totalorder %v830_v1, 127  ;;  %vm843_vm4 = vmand %vm106_vm0, %vm110_vm2  ;;  %v133_v8 = vsel %vm131_vm1, 0.0, %v74_v5  ;;  %v134_v10 = vsel %vm131_vm1, 0.0, %v75_v6  ;;  %vm90_vm6 = vcmp.eq.s32.totalorder %v832_v2, 0 }
  0x3e   :  { %vm122_vm5 = vcmp.eq.s32.totalorder %v838_v3, 30  ;;  %v855_v12 = vsel %vm136_vm3, 3.0, %v133_v8  ;;  %v859_v13 = vsel %vm136_vm3, 3.0, %v134_v10  ;;  %v115_v14 = vsel %vm843_vm4, 0.0, %v73_v11  ;;  %p680_p13 = por %p679_p12, %p678_p11 }
  0x3f   :  { %vm97_vm7 = vcmp.eq.s32.totalorder %v838_v3, 31  ;;  %vm126_vm8 = vmand %vm122_vm5, %vm110_vm2  ;;  %vm150_vm9 = vcmp.eq.f32.partialorder %v855_v12, 1.0  ;;  %vm151_vm10 = vcmp.eq.f32.partialorder %v859_v13, 1.0  ;;  %v132_v16 = vsel %vm131_vm1, 0.0, %v115_v14 }
  0x40   :  { %v130_v17 = vsel %vm126_vm8, 0.0, %v76_v15  ;;  %v870_v18 = vsel %vm150_vm9, 0.0, %v78_v7  ;;  %v872_v19 = vsel %vm151_vm10, 0.0, %v79_v9  ;;  %v137_v21 = vsel %vm136_vm3, 3.0, %v132_v16  ;;  %p681_p0 = pnand %p680_p13, %p674_p10 }
  0x41   :  { %v135_v22 = vsel %vm131_vm1, 0.0, %v130_v17  ;;  %367 = vrot.lane.b32.xlu1 %v870_v18, %s742_s2  ;;  %158 = vst [vmem:[#allocation9 + $0x8] sm:$0xff] %v870_v18  ;;  %359 = vrot.lane.b32.xlu0 %v870_v18, %s743_s29  ;;  %159 = vst [vmem:[#allocation9 + $0x10] sm:$0xff] %v872_v19  ;;  %v886_v23 = vsel %vm90_vm6, 3.0, %v137_v21  ;;  %v384_v26 = vrot.slane %v872_v19, 1  ;;  %vm386_vm11 = vcmp.lt.s32.totalorder %v832_v2, 7 }
  0x42   :  { %v140_v25 = vsel %vm136_vm3, 3.0, %v135_v22  ;;  %vm149_vm12 = vcmp.eq.f32.partialorder %v886_v23, 1.0  ;;  %v374_v28 = vrot.slane %v870_v18, 7  ;;  %v383_v29 = vrot.slane %v870_v18, 1 }
  0x43   :  { %v895_v27 = vsel %vm97_vm7, 3.0, %v140_v25  ;;  %v899_v30 = vsel %vm149_vm12, 0.0, %v77_v20  ;;  %vm377_vm14 = vcmp.lt.s32.totalorder %v832_v2, 1  ;;  %v375_v31 = vrot.slane %v872_v19, 7 }
  0x44   :  { %vm152_vm13 = vcmp.eq.f32.partialorder %v895_v27, 1.0  ;;  %157 = vst [vmem:[#allocation9] sm:$0xff] %v899_v30  ;;  %v373_v33 = vrot.slane %v899_v30, 7  ;;  %v910_v34 = vsel %vm386_vm11, %v383_v29, %v384_v26  ;;  %v382_v38 = vrot.slane %v899_v30, 1 }
  0x45   :  { %v905_v32 = vsel %vm152_vm13, 0.0, %v80_v24  ;;  %369 = vrot.lane.b32.xlu1 %v872_v19, %s742_s2  ;;  %361 = vrot.lane.b32.xlu0 %v872_v19, %s743_s29  ;;  %v920_v36 = vsel %vm377_vm14, %v374_v28, %v375_v31  ;;  %vm176_vm15 = vcmp.eq.f32.partialorder %v895_v27, 0.0  ;;  %vm192_vm0 = vcmp.eq.f32.partialorder %v895_v27, 2.0 }
  0x46   :  { %160 = vst [vmem:[#allocation9 + $0x18] sm:$0xff] %v905_v32  ;;  %v385_v35 = vrot.slane %v905_v32, 1  ;;  %v376_v37 = vrot.slane %v905_v32, 7  ;;  %v926_v39 = vsel %vm377_vm14, %v373_v33, %v374_v28  ;;  %v938_v43 = vsel %vm386_vm11, %v382_v38, %v383_v29 }
  0x47   :  { %v417_v40 = vsub.f32 %v910_v34, %v926_v39  ;;  %v553_v52 = vsel %vm176_vm15, 1.0, %v744_v51  ;;  %v557_v53 = vsel %vm192_vm0, 1.0, %v744_v51  ;;  %vm208_vm1 = vcmp.eq.f32.partialorder %v895_v27, 3.0 }
  0x48   :  { %v932_v41 = vsel %vm386_vm11, %v384_v26, %v385_v35  ;;  %v381_v42 = vsel %vm377_vm14, %v376_v37, %v373_v33  ;;  %v949_v46 = vsel %vm377_vm14, %v375_v31, %v376_v37  ;;  %v390_v48 = vsel %vm386_vm11, %v385_v35, %v382_v38 }
  0x49   :  { %v418_v44 = vsub.f32 %v932_v41, %v920_v36  ;;  %v945_v45 = vsel %vm90_vm6, %v938_v43, %v381_v42  ;;  %365 = vrot.lane.b32.xlu1 %v899_v30, %s742_s2  ;;  %357 = vrot.lane.b32.xlu0 %v899_v30, %s743_s29  ;;  %v962_v49 = vsel %vm97_vm7, %v949_v46, %v390_v48  ;;  %v561_v55 = vsel %vm208_vm1, 1.0, %v744_v51 }
  0x4a   :  { %v416_v47 = vsub.f32 %v938_v43, %v945_v45  ;;  %v419_v50 = vsub.f32 %v962_v49, %v949_v46  ;;  %v204_v54 = vadd.f32 %v557_v53, %v553_v52  ;;  %vm224_vm2 = vcmp.eq.f32.partialorder %v895_v27, 4.0 }
  0x4b   :  { %v565_v57 = vsel %vm224_vm2, 1.0, %v744_v51  ;;  %vm240_vm4 = vcmp.eq.f32.partialorder %v895_v27, 5.0  ;;  %vm256_vm5 = vcmp.eq.f32.partialorder %v895_v27, 6.0  ;;  %vm272_vm8 = vcmp.eq.f32.partialorder %v895_v27, 7.0 }
  0x4c   :  { %v220_v56 = vadd.f32 %v561_v55, %v204_v54  ;;  %v569_v59 = vsel %vm240_vm4, 1.0, %v744_v51  ;;  %v573_v61 = vsel %vm256_vm5, 1.0, %v744_v51  ;;  %v577_v63 = vsel %vm272_vm8, 1.0, %v744_v51  ;;  %v68_v55 = vld [vmem:[#allocation2] sm:$0xff] }
  0x4d   :  { %371 = vrot.lane.b32.xlu1 %v905_v32, %s742_s2  ;;  %363 = vrot.lane.b32.xlu0 %v905_v32, %s743_s29  ;;  %vm288_vm9 = vcmp.eq.f32.partialorder %v895_v27, 8.0  ;;  %vm304_vm10 = vcmp.eq.f32.partialorder %v895_v27, 9.0  ;;  %vm320_vm11 = vcmp.eq.f32.partialorder %v895_v27, 10.0  ;;  %vm336_vm12 = vcmp.eq.f32.partialorder %v895_v27, 11.0 }
  0x4e   :  { %v236_v58 = vadd.f32 %v565_v57, %v220_v56  ;;  %v581_v4 = vsel %vm288_vm9, 1.0, %v744_v51  ;;  %v585_v6 = vsel %vm304_vm10, 1.0, %v744_v51  ;;  %v589_v8 = vsel %vm320_vm11, 1.0, %v744_v51 }
  0x4f   :  { %v593_v10 = vsel %vm336_vm12, 1.0, %v744_v51  ;;  %vm173_vm13 = vcmp.eq.f32.partialorder %v886_v23, 0.0  ;;  %vm189_vm14 = vcmp.eq.f32.partialorder %v886_v23, 2.0  ;;  %vm174_vm15 = vcmp.eq.f32.partialorder %v855_v12, 0.0 }
  0x50   :  { %v252_v60 = vadd.f32 %v569_v59, %v236_v58  ;;  %vm175_vm0 = vcmp.eq.f32.partialorder %v859_v13, 0.0  ;;  %v550_v15 = vsel %vm173_vm13, 1.0, %v744_v51  ;;  %vm190_vm1 = vcmp.eq.f32.partialorder %v855_v12, 2.0 }
  0x51   :  { %vm191_vm2 = vcmp.eq.f32.partialorder %v859_v13, 2.0  ;;  %v554_v16 = vsel %vm189_vm14, 1.0, %v744_v51  ;;  %vm205_vm4 = vcmp.eq.f32.partialorder %v886_v23, 3.0  ;;  %v551_v17 = vsel %vm174_vm15, 1.0, %v744_v51 }
  0x52   :  { %v268_v62 = vadd.f32 %v573_v61, %v252_v60  ;;  %v552_v20 = vsel %vm175_vm0, 1.0, %v744_v51  ;;  %v555_v21 = vsel %vm190_vm1, 1.0, %v744_v51  ;;  %v556_v22 = vsel %vm191_vm2, 1.0, %v744_v51 }
  0x53   :  { %v201_v24 = vadd.f32 %v554_v16, %v550_v15  ;;  %vm206_vm5 = vcmp.eq.f32.partialorder %v855_v12, 3.0  ;;  %vm207_vm8 = vcmp.eq.f32.partialorder %v859_v13, 3.0  ;;  %v558_v25 = vsel %vm205_vm4, 1.0, %v744_v51  ;;  %v87_v16 = vld [vmem:[#allocation8 + $0x28] sm:$0xff] }
  0x54   :  { %v284_v0 = vadd.f32 %v577_v63, %v268_v62  ;;  %vm221_vm9 = vcmp.eq.f32.partialorder %v886_v23, 4.0  ;;  %v202_v26 = vadd.f32 %v555_v21, %v551_v17  ;;  %v559_v28 = vsel %vm206_vm5, 1.0, %v744_v51 }
  0x55   :  { %v560_v29 = vsel %vm207_vm8, 1.0, %v744_v51  ;;  %v217_v31 = vadd.f32 %v558_v25, %v201_v24  ;;  %vm222_vm10 = vcmp.eq.f32.partialorder %v855_v12, 4.0  ;;  %vm223_vm11 = vcmp.eq.f32.partialorder %v859_v13, 4.0 }
  0x56   :  { %v300_v5 = vadd.f32 %v581_v4, %v284_v0  ;;  %v562_v33 = vsel %vm221_vm9, 1.0, %v744_v51  ;;  %vm237_vm12 = vcmp.eq.f32.partialorder %v886_v23, 5.0  ;;  %v218_v35 = vadd.f32 %v559_v28, %v202_v26  ;;  %v69_v0 = vld [vmem:[#allocation2 + $0x8] sm:$0xff] }
  0x57   :  { %v563_v38 = vsel %vm222_vm10, 1.0, %v744_v51  ;;  %v564_v42 = vsel %vm223_vm11, 1.0, %v744_v51  ;;  %v233_v48 = vadd.f32 %v562_v33, %v217_v31  ;;  %vm238_vm13 = vcmp.eq.f32.partialorder %v855_v12, 5.0 }
  0x58   :  { %v316_v7 = vadd.f32 %v585_v6, %v300_v5  ;;  %vm239_vm14 = vcmp.eq.f32.partialorder %v859_v13, 5.0  ;;  %v566_v52 = vsel %vm237_vm12, 1.0, %v744_v51  ;;  %vm253_vm15 = vcmp.eq.f32.partialorder %v886_v23, 6.0 }
  0x59   :  { %v234_v53 = vadd.f32 %v563_v38, %v218_v35  ;;  %v567_v56 = vsel %vm238_vm13, 1.0, %v744_v51  ;;  %v568_v57 = vsel %vm239_vm14, 1.0, %v744_v51  ;;  %v249_v58 = vadd.f32 %v566_v52, %v233_v48  ;;  %v86_v38 = vld [vmem:[#allocation8 + $0x20] sm:$0xff] }
  0x5a   :  { %v332_v9 = vadd.f32 %v589_v8, %v316_v7  ;;  %vm254_vm0 = vcmp.eq.f32.partialorder %v855_v12, 6.0  ;;  %vm255_vm1 = vcmp.eq.f32.partialorder %v859_v13, 6.0  ;;  %v570_v59 = vsel %vm253_vm15, 1.0, %v744_v51  ;;  %v70_v8 = vld [vmem:[#allocation2 + $0x10] sm:$0xff] }
  0x5b   :  { %vm391_vm2 = vcmp.eq.s32.totalorder %v830_v1, 0  ;;  %v1032_v60 = vmul.f32 4.0, %v870_v18  ;;  %v1035_v61 = vmul.f32 0.375, %v870_v18  ;;  %v1038_v62 = vmul.f32 4.0, %v872_v19  ;;  %v71_v18 = vld [vmem:[#allocation2 + $0x18] sm:$0xff] }
  0x5c   :  { %v992_v11 = vadd.f32 %v593_v10, %v332_v9  ;;  %vm269_vm4 = vcmp.eq.f32.partialorder %v886_v23, 7.0  ;;  %v1042_v63 = vmul.f32 4.0, %v899_v30  ;;  %v102_v4 = vsel %vm90_vm6, 1.0, %v68_v55 }
  0x5d   :  { %v250_v5 = vadd.f32 %v567_v56, %v234_v53  ;;  %v1047_v7 = vmul.f32 4.0, %v905_v32  ;;  %v571_v9 = vsel %vm254_vm0, 1.0, %v744_v51  ;;  %v572_v10 = vsel %vm255_vm1, 1.0, %v744_v51 }
  0x5e   :  { %v352_v14 = vmul.f32 %v992_v11, %v895_v27  ;;  %v203_v27 = vadd.f32 %v556_v22, %v552_v20  ;;  %v421_v2 = vmul.f32 0.5, %v417_v40  ;;  %vm270_vm6 = vcmp.eq.f32.partialorder %v855_v12, 7.0  ;;  %v88_v22 = vld [vmem:[#allocation8 + $0x30] sm:$0xff] }
  0x5f   :  { %vm271_vm5 = vcmp.eq.f32.partialorder %v859_v13, 7.0  ;;  %v574_v15 = vsel %vm269_vm4, 1.0, %v744_v51  ;;  %v422_v17 = vmul.f32 0.5, %v418_v44  ;;  %v1064_v20 = vadd.f32 -1.0, %v102_v4 }
  0x60   :  { %356 = vst [vmem:[#allocation10 + $0x18] sm:$0xff] %v352_v14  ;;  %v219_v37 = vadd.f32 %v560_v29, %v203_v27  ;;  %v265_v14 = vadd.f32 %v570_v59, %v249_v58  ;;  %v1066_v21 = vadd.f32 -1.0, %v69_v0  ;;  %vm285_vm8 = vcmp.eq.f32.partialorder %v886_v23, 8.0 }
  0x61   :  { %v105_v40 = vsel %vm97_vm7, 1.0, %v71_v18  ;;  %v1071_v24 = vadd.f32 -1.0, %v70_v8  ;;  %v266_v25 = vadd.f32 %v571_v9, %v250_v5  ;;  %v575_v27 = vsel %vm270_vm6, 1.0, %v744_v51  ;;  %v82_v18 = vld [vmem:[#allocation8 + $0x8] sm:$0xff] }
  0x62   :  { %v235_v54 = vadd.f32 %v564_v42, %v219_v37  ;;  %v576_v28 = vsel %vm271_vm5, 1.0, %v744_v51  ;;  %v281_v29 = vadd.f32 %v574_v15, %v265_v14  ;;  %vm286_vm9 = vcmp.eq.f32.partialorder %v855_v12, 8.0  ;;  %v89_v42 = vld [vmem:[#allocation8 + $0x38] sm:$0xff] }
  0x63   :  { %v449_v44 = vmul.f32 %v421_v2, %v87_v16  ;;  %v420_v31 = vmul.f32 0.5, %v416_v47  ;;  %vm287_vm10 = vcmp.eq.f32.partialorder %v859_v13, 8.0  ;;  %v578_v3 = vsel %vm285_vm8, 1.0, %v744_v51 }
  0x64   :  { %v251_v6 = vadd.f32 %v568_v57, %v235_v54  ;;  %v1081_v33 = vmul.f32 %v422_v17, %v88_v22  ;;  %v423_v35 = vmul.f32 0.5, %v419_v50  ;;  %v1086_v37 = vadd.f32 -1.0, %v105_v40 }
  0x65   :  { %vm301_vm7 = vcmp.eq.f32.partialorder %v886_v23, 9.0  ;;  %v165_v48 = vand.u32 2147483647, %v1064_v20  ;;  %v282_v52 = vadd.f32 %v575_v27, %v266_v25  ;;  %v579_v53 = vsel %vm286_vm9, 1.0, %v744_v51 }
  0x66   :  { %v267_v26 = vadd.f32 %v572_v10, %v251_v6  ;;  %v580_v56 = vsel %vm287_vm10, 1.0, %v744_v51  ;;  %v297_v57 = vadd.f32 %v578_v3, %v281_v29  ;;  %vm302_vm11 = vcmp.eq.f32.partialorder %v855_v12, 9.0 }
  0x67   :  { %vm303_vm12 = vcmp.eq.f32.partialorder %v859_v13, 9.0  ;;  %v166_v59 = vand.u32 2147483647, %v1066_v21  ;;  %v582_v0 = vsel %vm301_vm7, 1.0, %v744_v51  ;;  %v1102_v6 = vmul.f32 %v420_v31, %v86_v38  ;;  %v83_v31 = vld [vmem:[#allocation8 + $0x10] sm:$0xff] }
  0x68   :  { %v283_v47 = vadd.f32 %v576_v28, %v267_v26  ;;  %v1104_v8 = vmul.f32 %v423_v35, %v89_v42  ;;  %v298_v9 = vadd.f32 %v579_v53, %v282_v52  ;;  %v583_v14 = vsel %vm302_vm11, 1.0, %v744_v51 }
  0x69   :  { %v584_v2 = vsel %vm303_vm12, 1.0, %v744_v51  ;;  %v313_v40 = vadd.f32 %v582_v0, %v297_v57  ;;  %vm318_vm13 = vcmp.eq.f32.partialorder %v855_v12, 10.0  ;;  %vm317_vm14 = vcmp.eq.f32.partialorder %v886_v23, 10.0  ;;  %v81_v0 = vld [vmem:[#allocation8] sm:$0xff] }
  0x6a   :  { %v299_v10 = vadd.f32 %v580_v56, %v283_v47  ;;  %vm319_vm15 = vcmp.eq.f32.partialorder %v859_v13, 10.0  ;;  %v314_v3 = vadd.f32 %v583_v14, %v298_v9  ;;  %v587_v38 = vsel %vm318_vm13, 1.0, %v744_v51 }
  0x6b   :  { %vm334_vm0 = vcmp.eq.f32.partialorder %v855_v12, 11.0  ;;  %v586_v57 = vsel %vm317_vm14, 1.0, %v744_v51  ;;  %vm335_vm1 = vcmp.eq.f32.partialorder %v859_v13, 11.0  ;;  %vm333_vm4 = vcmp.eq.f32.partialorder %v886_v23, 11.0 }
  0x6c   :  { %v315_v35 = vadd.f32 %v584_v2, %v299_v10  ;;  %v592_v1 = vsel %vm335_vm1, 1.0, %v744_v51 }
  0xb3   :  { %v368_v54 = vpop.permute.xlu1 %367  ;;  %v360_v55 = vpop.permute.xlu0 %359 }
  0xb4   :  { %v393_v50 = vsel %vm391_vm2, %v368_v54, %v360_v55  ;;  %v397_v58 = vsel %vm136_vm3, %v360_v55, %v368_v54 }
  0xb5   :  { %v409_v4 = vsub.f32 %v397_v58, %v393_v50  ;;  %v425_v5 = vadd.f32 %v397_v58, %v393_v50 }
  0xb7   :  { %v413_v15 = vmul.f32 0.5, %v409_v4  ;;  %v429_v16 = vadd.f32 %v425_v5, %v926_v39  ;;  %v370_v17 = vpop.permute.xlu1 %369  ;;  %v362_v22 = vpop.permute.xlu0 %361  ;;  %v330_v5 = vadd.f32 %v587_v38, %v314_v3 }
  0xb8   :  { %v394_v25 = vsel %vm391_vm2, %v370_v17, %v362_v22  ;;  %v398_v26 = vsel %vm136_vm3, %v362_v22, %v370_v17 }
  0xb9   :  { %v433_v27 = vadd.f32 %v429_v16, %v910_v34  ;;  %v445_v28 = vmul.f32 %v413_v15, %v82_v18  ;;  %v410_v29 = vsub.f32 %v398_v26, %v394_v25  ;;  %v426_v39 = vadd.f32 %v398_v26, %v394_v25 }
  0xba   :  { %v591_v18 = vsel %vm334_vm0, 1.0, %v744_v51  ;;  %v466_v25 = vmul.f32 0.375, %v872_v19 }
  0xbb   :  { %v441_v42 = vsub.f32 %v433_v27, %v1032_v60  ;;  %v453_v52 = vadd.f32 %v449_v44, %v445_v28  ;;  %v414_v47 = vmul.f32 0.5, %v410_v29  ;;  %v430_v53 = vadd.f32 %v426_v39, %v920_v36  ;;  %v366_v54 = vpop.permute.xlu1 %365  ;;  %v358_v55 = vpop.permute.xlu0 %357  ;;  %v84_v29 = vld [vmem:[#allocation8 + $0x18] sm:$0xff] }
  0xbc   :  { %v392_v34 = vsel %vm391_vm2, %v366_v54, %v358_v55  ;;  %v396_v56 = vsel %vm136_vm3, %v358_v55, %v366_v54  ;;  %v588_v60 = vsel %vm319_vm15, 1.0, %v744_v51 }
  0xbd   :  { %v457_v44 = vmul.f32 2.6666667, %v441_v42  ;;  %v434_v50 = vadd.f32 %v430_v53, %v932_v41  ;;  %v446_v36 = vmul.f32 %v414_v47, %v83_v31  ;;  %v408_v58 = vsub.f32 %v396_v56, %v392_v34 }
  0xbe   :  { %v424_v4 = vadd.f32 %v396_v56, %v392_v34  ;;  %v331_v31 = vadd.f32 %v588_v60, %v315_v35  ;;  %v329_v42 = vadd.f32 %v586_v57, %v313_v40  ;;  %v167_v47 = vand.u32 2147483647, %v1071_v24 }
  0xbf   :  { %v461_v9 = vsub.f32 %v453_v52, %v457_v44  ;;  %v442_v10 = vsub.f32 %v434_v50, %v1038_v62  ;;  %v454_v14 = vadd.f32 %v1081_v33, %v446_v36  ;;  %v412_v2 = vmul.f32 0.5, %v408_v58  ;;  %v372_v15 = vpop.permute.xlu1 %371  ;;  %v364_v16 = vpop.permute.xlu0 %363 }
  0xc0   :  { %v428_v41 = vadd.f32 %v424_v4, %v945_v45  ;;  %v395_v17 = vsel %vm391_vm2, %v372_v15, %v364_v16  ;;  %v399_v22 = vsel %vm136_vm3, %v364_v16, %v372_v15  ;;  %v346_v52 = vadd.f32 %v591_v18, %v330_v5 }
  0xc1   :  { %v469_v26 = vsub.f32 %v461_v9, %v1035_v61  ;;  %v458_v27 = vmul.f32 2.6666667, %v442_v10  ;;  %v444_v28 = vmul.f32 %v412_v2, %v81_v0  ;;  %v411_v62 = vsub.f32 %v399_v22, %v395_v17 }
  0xc2   :  { %v432_v33 = vadd.f32 %v428_v41, %v938_v43  ;;  %v427_v39 = vadd.f32 %v399_v22, %v395_v17  ;;  %v590_v35 = vsel %vm333_vm4, 1.0, %v744_v51  ;;  %v347_v34 = vadd.f32 %v592_v1, %v331_v31 }
  0xc3   :  { %v462_v45 = vsub.f32 %v454_v14, %v458_v27  ;;  %v452_v3 = vadd.f32 %v1102_v6, %v444_v28  ;;  %v415_v38 = vmul.f32 0.5, %v411_v62  ;;  %v464_v6 = vmul.f32 0.375, %v899_v30 }
  0xc4   :  { %v440_v19 = vsub.f32 %v432_v33, %v1042_v63  ;;  %v431_v61 = vadd.f32 %v427_v39, %v949_v46  ;;  %v170_v63 = vmul.f32 112.5, %v166_v59  ;;  %v345_v57 = vadd.f32 %v590_v35, %v329_v42 }
  0xc5   :  { %v447_v43 = vmul.f32 %v415_v38, %v84_v29  ;;  %v470_v53 = vsub.f32 %v462_v45, %v466_v25  ;;  %v473_v60 = vmul.f32 %v469_v26, %v346_v52  ;;  %v168_v24 = vand.u32 2147483647, %v1086_v37 }
  0xc6   :  { %v456_v54 = vmul.f32 2.6666667, %v440_v19  ;;  %v435_v55 = vadd.f32 %v431_v61, %v962_v49  ;;  %v169_v51 = vmul.f32 112.5, %v165_v48  ;;  %v171_v44 = vmul.f32 112.5, %v167_v47 }
  0xc7   :  { %v455_v56 = vadd.f32 %v1104_v8, %v447_v43  ;;  %v467_v49 = vmul.f32 0.375, %v905_v32  ;;  %v474_v36 = vmul.f32 %v470_v53, %v347_v34  ;;  %v477_v21 = vsub.f32 %v473_v60, %v170_v63 }
  0xc8   :  { %v460_v46 = vsub.f32 %v452_v3, %v456_v54  ;;  %v443_v40 = vsub.f32 %v435_v55, %v1047_v7  ;;  %v172_v59 = vmul.f32 112.5, %v168_v24  ;;  %v349_v32 = vmul.f32 %v345_v57, %v886_v23 }
  0xc9   :  { %v478_v7 = vsub.f32 %v474_v36, %v171_v44  ;;  %v481_v37 = vmul.f32 %v477_v21, %v477_v21  ;;  %v350_v15 = vmul.f32 %v346_v52, %v855_v12  ;;  %v351_v16 = vmul.f32 %v347_v34, %v859_v13 }
  0xca   :  { %v468_v30 = vsub.f32 %v460_v46, %v464_v6  ;;  %v459_v50 = vmul.f32 2.6666667, %v443_v40  ;;  %353 = vst [vmem:[#allocation10] sm:$0xff] %v349_v32 }
  0xcb   :  { %v482_v20 = vmul.f32 %v478_v7, %v478_v7  ;;  %354 = vst [vmem:[#allocation10 + $0x8] sm:$0xff] %v350_v15  ;;  %355 = vst [vmem:[#allocation10 + $0x10] sm:$0xff] %v351_v16 }
  0xcc   :  { %v463_v8 = vsub.f32 %v455_v56, %v459_v50  ;;  %v472_v58 = vmul.f32 %v468_v30, %v345_v57 }
  0xce   :  { %v471_v0 = vsub.f32 %v463_v8, %v467_v49  ;;  %v476_v4 = vsub.f32 %v472_v58, %v169_v51 }
  0xd0   :  { %v475_v5 = vmul.f32 %v471_v0, %v992_v11  ;;  %v480_v18 = vmul.f32 %v476_v4, %v476_v4 }
  0xd2   :  { %v479_v9 = vsub.f32 %v475_v5, %v172_v59  ;;  %v484_v48 = vadd.f32 %v481_v37, %v480_v18 }
  0xd4   :  { %v483_v10 = vmul.f32 %v479_v9, %v479_v9  ;;  %v485_v14 = vadd.f32 %v484_v48, %v482_v20 }
  0xd6   :  { %v486_v2 = vadd.f32 %v485_v14, %v483_v10 }
  0xd8   :  { %487 = vadd.xlane.f32.xlu0 %v486_v2 }
  0xd9   :  { %684 = shalt.err (!%p681_p0)
}
  0xda   :  { %s685_s14 = scalar_lea.hbm %s1221_s3, 512 }
  0xdb   :  { %p686_p1 = scmp.ne.s32.totalorder %s1221_s3, %s685_s14  ;;  %p689_p2 = scmp.lt.u32.totalorder %s685_s14, %s1221_s3 }
  0xdd   :  { %p691_p3 = pnand %p689_p2, %p686_p1 }
  0xdf   :  { %694 = shalt.err (!%p691_p3)
}
  0xe0   :  { %510 = dma.vmem_to_hbm [thread:$0]  %s505_s8, 512, %s1221_s3, [#allocation4], %s739_s30, %s739_s30, %s740_s6  }
  0xe1   :  { %s695_s20 = scalar_lea.vmem %s1169_s10, 512  ;;  %p700_p5 = scmp.lt.s32.totalorder %s1169_s10, %s1169_s10 }
  0xe2   :  { %p696_p4 = scmp.ne.s32.totalorder %s1169_s10, %s695_s20  ;;  %p701_p6 = scmp.lt.s32.totalorder %s695_s20, %s695_s20 }
  0xe4   :  { %p702_p7 = por %p701_p6, %p700_p5 }
  0xe6   :  { %p703_p8 = pnand %p702_p7, %p696_p4 }
  0xe8   :  { %706 = shalt.err (!%p703_p8)
}
  0xe9   :  { %s707_s24 = scalar_lea.hbm %s1222_s4, 512 }
  0xea   :  { %p708_p9 = scmp.ne.s32.totalorder %s1222_s4, %s707_s24  ;;  %p711_p10 = scmp.lt.u32.totalorder %s707_s24, %s1222_s4 }
  0xec   :  { %p713_p11 = pnand %p711_p10, %p708_p9 }
  0xee   :  { %716 = shalt.err (!%p713_p11)
}
  0xef   :  { %522 = dma.vmem_to_hbm [thread:$0]  %s1169_s10, 512, %s1222_s4, [#allocation11], %s739_s30, %s739_s30, %s740_s6  }
  0xf0   :  { %s717_s8 = scalar_lea.hbm %s1223_s5, 16 }
  0xf1   :  { %p718_p12 = scmp.ne.s32.totalorder %s1223_s5, %s717_s8  ;;  %p721_p13 = scmp.lt.u32.totalorder %s717_s8, %s1223_s5 }
  0xf3   :  { %p723_p0 = pnand %p721_p13, %p718_p12 }
 0x165   :  { %v488_v12 = vpop.xlane.xlu0 %487 }
 0x166   :  { %v489_v13 = vrot.slane %v488_v12, 4 }
 0x168   :  { %v490_v23 = vadd.f32 %v489_v13, %v488_v12 }
 0x16a   :  { %v491_v11 = vrot.slane %v490_v23, 2 }
 0x16c   :  { %v492_v41 = vadd.f32 %v491_v11, %v490_v23 }
 0x16e   :  { %v493_v17 = vrot.slane %v492_v41, 1 }
 0x170   :  { %v494_v22 = vadd.f32 %v493_v17, %v492_v41 }
 0x172   :  { %594 = vpush %v494_v22 }
 0x1a3   :  { %s595_s21 = spop %594 }
 0x1a4   :  { %s496_s2 = smul.f32 0.00024414063, %s595_s21 }
 0x1a6   :  { %498 = sst [smem:[#allocation12]] %s496_s2 }
 0x1a7   :  { %726 = shalt.err (!%p723_p0)
}
 0x1a8   :  { %s747_s6 = smov [#allocation12]  }
 0x1a9   :  { %530 = dma.smem_to_hbm %s747_s6, 16, %s1223_s5, [#allocation5]  }
 0x1aa   :  { %731 = dma.done.wait [#allocation4], 512  }
 0x1ab   :  { %732 = vsyncadd [#allocation4], 4294966784 }
 0x1ac   :  { %733 = dma.done.wait [#allocation11], 512  }
 0x1ad   :  { %734 = vsyncadd [#allocation11], 4294966784 }
 0x1ae   :  { %735 = dma.done.wait [#allocation5], 16  }
 0x1af   :  { %736 = vsyncadd [#allocation5], 4294967280 }
 0x1b0   :  { %540 = sfence }
 0x1b1   :  { %541 = vsyncpa [#allocation3], 1 }
 0x1b2   :  { %542 = vsyncpa [#allocation7], 1 }
 0x1b3   :  { %543 = vsyncpa [#allocation4], 1 }
 0x1b4   :  { %544 = vsyncpa [#allocation11], 1 }
 0x1b5   :  { %545 = vsyncpa [#allocation5], 1 }

</bundles_post_ra>
